<compile_context>
chip_gen: v7x
topology: tpu7x:2x2x1
jax: 0.10.0
libtpu: 0.0.40
codegen_flags: <defaults>
</compile_context>

<pallas_src>
import functools

import jax
import jax.numpy as jnp
from jax.experimental import pallas as pl
from jax.experimental.pallas import tpu as pltpu


def _round_up(x: int, m: int) -> int:
    return ((x + m - 1) // m) * m


def _pad_to(a, shape):
    pads = [(0, s - d) for d, s in zip(a.shape, shape)]
    if all(p == (0, 0) for p in pads):
        return a
    return jnp.pad(a, pads)


def _bf16_epilogue_default() -> bool:
    # bf16 VPU/EUP exists on v6e/v7x; keep the bias+tanh epilogue in f32 elsewhere (e.g. v5e).
    try:
        kind = jax.devices()[0].device_kind.lower()
    except Exception:
        return False
    return ("v6" in kind) or ("v7" in kind)


def classification_head_kernel(x_ref, w1_ref, b1_ref, w2_ref, b2_ref, o_ref, *, bf16_epilogue):
    # TODO(synk): dropout is identity in eval mode; training-mode dropout (prng-based masking)
    # is intentionally not implemented here.
    x = x_ref[...].astype(jnp.bfloat16)              # f32->bf16 cast on VPU, hides under the MXU

    # dense: canonical [M,K] @ [K,N] contraction (weight pre-transposed on the host).
    h = jnp.dot(x, w1_ref[...], preferred_element_type=jnp.float32)   # [tb, D_inner_p] f32
    h = h + b1_ref[...]                                               # f32 bias add (VPU)
    if bf16_epilogue:
        h = jnp.tanh(h.astype(jnp.bfloat16))          # bf16 tanh on the EUP (v6e/v7x)
    else:
        h = jnp.tanh(h).astype(jnp.bfloat16)          # f32 tanh (v5e), downcast for the MXU

    # out_proj: canonical contraction again.
    out = jnp.dot(h, w2_ref[...], preferred_element_type=jnp.float32)  # [tb, C_p] f32
    o_ref[...] = (out + b2_ref[...]).astype(o_ref.dtype)


@functools.partial(jax.jit,
                   static_argnames=("tile_b", "bf16_epilogue", "single_buffer_weights"))
def _classification_head(features, w_dense, b_dense, w_out, b_out, *,
                         tile_b, bf16_epilogue, single_buffer_weights):
    B, D_in = features.shape
    D_inner = w_dense.shape[0]
    C = w_out.shape[0]

    # Lane dims padded to multiples of 128 (full MXU tiles, lane-dense output stores).
    D_in_p = _round_up(D_in, 128)
    D_inner_p = _round_up(D_inner, 128)
    C_p = _round_up(C, 128)

    # Batch tile: aim for >= 4 grid steps (DMA pipelining + megacore sharding on v7x) with
    # minimal batch padding; multiple of 8 sublanes, capped at tile_b.
    tb = max(8, min(tile_b, _round_up(pl.cdiv(B, 4), 8)))
    B_p = _round_up(B, tb)
    n_tiles = B_p // tb

    # Weights: transpose once on the host to [K, N] (amortized over all tiles / calls), pad, cast.
    w1_t = _pad_to(w_dense.T, (D_in_p, D_inner_p)).astype(jnp.bfloat16)   # [D_in_p, D_inner_p]
    w2_t = _pad_to(w_out.T, (D_inner_p, C_p)).astype(jnp.bfloat16)        # [D_inner_p, C_p]
    b1_p = _pad_to(b_dense, (D_inner_p,)).reshape(1, D_inner_p).astype(jnp.float32)
    b2_p = _pad_to(b_out, (C_p,)).reshape(1, C_p).astype(jnp.float32)

    # Activations: avoid a standalone HBM cast pass. Only touch x on the host when it actually
    # needs zero-padding (fold the bf16 cast into that pass); otherwise pass f32 straight through
    # and cast inside the kernel.
    if (B_p != B) or (D_in_p != D_in):
        x_p = _pad_to(features, (B_p, D_in_p)).astype(jnp.bfloat16)
    else:
        x_p = features

    # Grid-invariant operands: single-buffer them when supported (halves resident-weight VMEM).
    def const_spec(shape):
        if single_buffer_weights:
            return pl.BlockSpec(shape, lambda i: (0,) * len(shape),
                                pipeline_mode=pl.Buffered(1))
        return pl.BlockSpec(shape, lambda i: (0,) * len(shape))

    # Explicit scoped-VMEM budget (defaults: 16 MiB v5e, 32 MiB v6e/v7x).
    wbuf = 1 if single_buffer_weights else 2
    est = (wbuf * (w1_t.size * 2 + w2_t.size * 2 + b1_p.size * 4 + b2_p.size * 4)
           + 2 * tb * D_in_p * x_p.dtype.itemsize      # double-buffered activation tiles
           + 2 * tb * C_p * 4                          # double-buffered output tiles (f32)
           + tb * D_inner_p * 4)                       # f32 intermediate
    vmem_limit = int(min(64 * 1024 * 1024, max(32 * 1024 * 1024, 2 * est)))

    out_p = pl.pallas_call(
        functools.partial(classification_head_kernel, bf16_epilogue=bf16_epilogue),
        out_shape=jax.ShapeDtypeStruct((B_p, C_p), features.dtype),
        grid=(n_tiles,),
        in_specs=[
            pl.BlockSpec((tb, D_in_p), lambda i: (i, 0)),   # activations: tiled over batch
            const_spec((D_in_p, D_inner_p)),                # dense weight [K, N], VMEM-resident
            const_spec((1, D_inner_p)),                     # dense bias
            const_spec((D_inner_p, C_p)),                   # out_proj weight [K, N], VMEM-resident
            const_spec((1, C_p)),                           # out_proj bias
        ],
        out_specs=pl.BlockSpec((tb, C_p), lambda i: (i, 0)),
        compiler_params=pltpu.CompilerParams(
            dimension_semantics=("parallel",),
            vmem_limit_bytes=vmem_limit),
    )(x_p, w1_t, b1_p, w2_t, b2_p)

    return out_p[:B, :C]


_BF16_EPILOGUE = _bf16_epilogue_default()
_SINGLE_BUFFER_OK = None   # lazily resolved: does this jax build accept pl.Buffered(1) at top level?


def classification_head(features, w_dense, b_dense, w_out, b_out, *, tile_b=512):
    """features: [B, input_dim] float32.
    w_dense: [inner_dim, input_dim], b_dense: [inner_dim]
    w_out:   [num_classes, inner_dim], b_out: [num_classes]
    (PyTorch nn.Linear weight layout; transposed once on the host inside the wrapper.)
    """
    global _SINGLE_BUFFER_OK
    if _SINGLE_BUFFER_OK is None:
        try:
            out = _classification_head(features, w_dense, b_dense, w_out, b_out,
                                        tile_b=tile_b, bf16_epilogue=_BF16_EPILOGUE,
                                        single_buffer_weights=True)
            jax.block_until_ready(out)
            _SINGLE_BUFFER_OK = True
            return out
        except Exception:
            # pipeline_mode not supported by this jax build: fall back to default double buffering.
            _SINGLE_BUFFER_OK = False
    return _classification_head(features, w_dense, b_dense, w_out, b_out,
                                tile_b=tile_b, bf16_epilogue=_BF16_EPILOGUE,
                                single_buffer_weights=_SINGLE_BUFFER_OK)


def reference(features, w_dense, b_dense, w_out, b_out):
    h = jnp.tanh(features @ w_dense.T + b_dense)
    return h @ w_out.T + b_out


if __name__ == "__main__":
    # Small shapes consistent with the module: input_dim=32, inner_dim=32, num_classes=8.
    B, D_in, D_inner, C = 8, 32, 32, 8

    key = jax.random.PRNGKey(0)
    k_x, k_w1, k_b1, k_w2, k_b2 = jax.random.split(key, 5)

    features = jax.random.normal(k_x, (B, D_in), dtype=jnp.float32)
    w_dense = jax.random.normal(k_w1, (D_inner, D_in), dtype=jnp.float32) * 0.1
    b_dense = jax.random.normal(k_b1, (D_inner,), dtype=jnp.float32) * 0.1
    w_out = jax.random.normal(k_w2, (C, D_inner), dtype=jnp.float32) * 0.1
    b_out = jax.random.normal(k_b2, (C,), dtype=jnp.float32) * 0.1

    out = classification_head(features, w_dense, b_dense, w_out, b_out)
    out = jax.block_until_ready(out)

    ref = reference(features, w_dense, b_dense, w_out, b_out)
    assert out.shape == (B, C)
    # bf16 MXU inputs with f32 accumulation -> loosen tolerance vs the pure-f32 reference.
    assert jnp.allclose(out, ref, atol=2e-2, rtol=2e-2), "mismatch vs reference"

    print("KERNEL_OK")
</pallas_src>

<mosaic_0001>
module attributes {stable_mosaic.version = 11 : i64} {
  func.func @classification_head_kernel(%arg0: i32, %arg1: memref<8x128xbf16, #tpu.memory_space<vmem>>, %arg2: memref<128x128xbf16, #tpu.memory_space<vmem>>, %arg3: memref<1x128xf32, #tpu.memory_space<vmem>>, %arg4: memref<128x128xbf16, #tpu.memory_space<vmem>>, %arg5: memref<1x128xf32, #tpu.memory_space<vmem>>, %arg6: memref<8x128xf32, #tpu.memory_space<vmem>>) attributes {dimension_semantics = [#tpu.dimension_semantics<parallel>], iteration_bounds = array<i64: 1>, scalar_prefetch = 0 : i64, scratch_operands = 0 : i64, tpu.core_type = #tpu.core_type<tc>, window_params = [{transform_indices = @transform_0, window_bounds = array<i64: 8, 128>}, {pipeline_mode = #tpu.pipeline_mode<synchronous>, transform_indices = @transform_1, window_bounds = array<i64: 128, 128>}, {pipeline_mode = #tpu.pipeline_mode<synchronous>, transform_indices = @transform_2, window_bounds = array<i64: 1, 128>}, {pipeline_mode = #tpu.pipeline_mode<synchronous>, transform_indices = @transform_3, window_bounds = array<i64: 128, 128>}, {pipeline_mode = #tpu.pipeline_mode<synchronous>, transform_indices = @transform_4, window_bounds = array<i64: 1, 128>}, {transform_indices = @transform_5, window_bounds = array<i64: 8, 128>}]} {
    %c0 = arith.constant 0 : index
    %c0_0 = arith.constant 0 : index
    %0 = vector.load %arg1[%c0, %c0_0] : memref<8x128xbf16, #tpu.memory_space<vmem>>, vector<8x128xbf16>
    %c0_1 = arith.constant 0 : index
    %c0_2 = arith.constant 0 : index
    %1 = vector.load %arg2[%c0_1, %c0_2] : memref<128x128xbf16, #tpu.memory_space<vmem>>, vector<128x128xbf16>
    %cst = arith.constant dense<0.000000e+00> : vector<8x128xf32>
    %2 = tpu.matmul %0, %1, %cst {dimension_numbers = #tpu.dot_dimension_numbers<[1], [0], [0], [1], [0, 0, 1, 1], [], []>} : vector<8x128xbf16>, vector<128x128xbf16>, vector<8x128xf32> -> vector<8x128xf32>
    %c0_3 = arith.constant 0 : index
    %c0_4 = arith.constant 0 : index
    %3 = vector.load %arg3[%c0_3, %c0_4] : memref<1x128xf32, #tpu.memory_space<vmem>>, vector<1x128xf32>
    %4 = vector.broadcast %3 : vector<1x128xf32> to vector<8x128xf32>
    %5 = arith.addf %2, %4 : vector<8x128xf32>
    %6 = math.tanh %5 : vector<8x128xf32>
    %7 = arith.truncf %6 : vector<8x128xf32> to vector<8x128xbf16>
    %c0_5 = arith.constant 0 : index
    %c0_6 = arith.constant 0 : index
    %8 = vector.load %arg4[%c0_5, %c0_6] : memref<128x128xbf16, #tpu.memory_space<vmem>>, vector<128x128xbf16>
    %cst_7 = arith.constant dense<0.000000e+00> : vector<8x128xf32>
    %9 = tpu.matmul %7, %8, %cst_7 {dimension_numbers = #tpu.dot_dimension_numbers<[1], [0], [0], [1], [0, 0, 1, 1], [], []>} : vector<8x128xbf16>, vector<128x128xbf16>, vector<8x128xf32> -> vector<8x128xf32>
    %c0_8 = arith.constant 0 : index
    %c0_9 = arith.constant 0 : index
    %10 = vector.load %arg5[%c0_8, %c0_9] : memref<1x128xf32, #tpu.memory_space<vmem>>, vector<1x128xf32>
    %11 = vector.broadcast %10 : vector<1x128xf32> to vector<8x128xf32>
    %12 = arith.addf %9, %11 : vector<8x128xf32>
    %c0_10 = arith.constant 0 : index
    %c0_11 = arith.constant 0 : index
    %13 = vector.load %arg6[%c0_10, %c0_11] : memref<8x128xf32, #tpu.memory_space<vmem>>, vector<8x128xf32>
    tpu.vector_store %arg6[%c0_10, %c0_11], %12 {strides = array<i32>} : memref<8x128xf32, #tpu.memory_space<vmem>>, vector<8x128xf32>,
    return
  }
  func.func @transform_0(%arg0: i32) -> (i32, i32) {
    %c0_i32 = arith.constant 0 : i32
    %c0_i32_0 = arith.constant 0 : i32
    return %arg0, %c0_i32 : i32, i32
  }
  func.func @transform_1(%arg0: i32) -> (i32, i32) {
    %c0_i32 = arith.constant 0 : i32
    %c0_i32_0 = arith.constant 0 : i32
    %c0_i32_1 = arith.constant 0 : i32
    return %c0_i32, %c0_i32_0 : i32, i32
  }
  func.func @transform_2(%arg0: i32) -> (i32, i32) {
    %c0_i32 = arith.constant 0 : i32
    %c0_i32_0 = arith.constant 0 : i32
    %c0_i32_1 = arith.constant 0 : i32
    return %c0_i32, %c0_i32_0 : i32, i32
  }
  func.func @transform_3(%arg0: i32) -> (i32, i32) {
    %c0_i32 = arith.constant 0 : i32
    %c0_i32_0 = arith.constant 0 : i32
    %c0_i32_1 = arith.constant 0 : i32
    return %c0_i32, %c0_i32_0 : i32, i32
  }
  func.func @transform_4(%arg0: i32) -> (i32, i32) {
    %c0_i32 = arith.constant 0 : i32
    %c0_i32_0 = arith.constant 0 : i32
    %c0_i32_1 = arith.constant 0 : i32
    return %c0_i32, %c0_i32_0 : i32, i32
  }
  func.func @transform_5(%arg0: i32) -> (i32, i32) {
    %c0_i32 = arith.constant 0 : i32
    %c0_i32_0 = arith.constant 0 : i32
    return %arg0, %c0_i32 : i32, i32
  }
}

module attributes {stable_mosaic.version = 11 : i64} {
  func.func @classification_head_kernel(%arg0: i32, %arg1: memref<8x128xbf16, #tpu.memory_space<vmem>>, %arg2: memref<128x128xbf16, #tpu.memory_space<vmem>>, %arg3: memref<1x128xf32, #tpu.memory_space<vmem>>, %arg4: memref<128x128xbf16, #tpu.memory_space<vmem>>, %arg5: memref<1x128xf32, #tpu.memory_space<vmem>>, %arg6: memref<8x128xf32, #tpu.memory_space<vmem>>) attributes {dimension_semantics = [#tpu.dimension_semantics<parallel>], iteration_bounds = array<i64: 1>, scalar_prefetch = 0 : i64, scratch_operands = 0 : i64, tpu.core_type = #tpu.core_type<tc>, window_params = [{transform_indices = @transform_0, window_bounds = array<i64: 8, 128>}, {pipeline_mode = #tpu.pipeline_mode<synchronous>, transform_indices = @transform_1, window_bounds = array<i64: 128, 128>}, {pipeline_mode = #tpu.pipeline_mode<synchronous>, transform_indices = @transform_2, window_bounds = array<i64: 1, 128>}, {pipeline_mode = #tpu.pipeline_mode<synchronous>, transform_indices = @transform_3, window_bounds = array<i64: 128, 128>}, {pipeline_mode = #tpu.pipeline_mode<synchronous>, transform_indices = @transform_4, window_bounds = array<i64: 1, 128>}, {transform_indices = @transform_5, window_bounds = array<i64: 8, 128>}]} {
    %c0 = arith.constant 0 : index
    %c0_0 = arith.constant 0 : index
    %0 = vector.load %arg1[%c0, %c0_0] : memref<8x128xbf16, #tpu.memory_space<vmem>>, vector<8x128xbf16>
    %c0_1 = arith.constant 0 : index
    %c0_2 = arith.constant 0 : index
    %1 = vector.load %arg2[%c0_1, %c0_2] : memref<128x128xbf16, #tpu.memory_space<vmem>>, vector<128x128xbf16>
    %cst = arith.constant dense<0.000000e+00> : vector<8x128xf32>
    %2 = tpu.matmul %0, %1, %cst {dimension_numbers = #tpu.dot_dimension_numbers<[1], [0], [0], [1], [0, 0, 1, 1], [], []>} : vector<8x128xbf16>, vector<128x128xbf16>, vector<8x128xf32> -> vector<8x128xf32>
    %c0_3 = arith.constant 0 : index
    %c0_4 = arith.constant 0 : index
    %3 = vector.load %arg3[%c0_3, %c0_4] : memref<1x128xf32, #tpu.memory_space<vmem>>, vector<1x128xf32>
    %4 = vector.broadcast %3 : vector<1x128xf32> to vector<8x128xf32>
    %5 = arith.addf %2, %4 : vector<8x128xf32>
    %6 = math.tanh %5 : vector<8x128xf32>
    %7 = arith.truncf %6 : vector<8x128xf32> to vector<8x128xbf16>
    %c0_5 = arith.constant 0 : index
    %c0_6 = arith.constant 0 : index
    %8 = vector.load %arg4[%c0_5, %c0_6] : memref<128x128xbf16, #tpu.memory_space<vmem>>, vector<128x128xbf16>
    %cst_7 = arith.constant dense<0.000000e+00> : vector<8x128xf32>
    %9 = tpu.matmul %7, %8, %cst_7 {dimension_numbers = #tpu.dot_dimension_numbers<[1], [0], [0], [1], [0, 0, 1, 1], [], []>} : vector<8x128xbf16>, vector<128x128xbf16>, vector<8x128xf32> -> vector<8x128xf32>
    %c0_8 = arith.constant 0 : index
    %c0_9 = arith.constant 0 : index
    %10 = vector.load %arg5[%c0_8, %c0_9] : memref<1x128xf32, #tpu.memory_space<vmem>>, vector<1x128xf32>
    %11 = vector.broadcast %10 : vector<1x128xf32> to vector<8x128xf32>
    %12 = arith.addf %9, %11 : vector<8x128xf32>
    %c0_10 = arith.constant 0 : index
    %c0_11 = arith.constant 0 : index
    %13 = vector.load %arg6[%c0_10, %c0_11] : memref<8x128xf32, #tpu.memory_space<vmem>>, vector<8x128xf32>
    tpu.vector_store %arg6[%c0_10, %c0_11], %12 {strides = array<i32>} : memref<8x128xf32, #tpu.memory_space<vmem>>, vector<8x128xf32>,
    return
  }
  func.func @transform_0(%arg0: i32) -> (i32, i32) {
    %c0_i32 = arith.constant 0 : i32
    %c0_i32_0 = arith.constant 0 : i32
    return %arg0, %c0_i32 : i32, i32
  }
  func.func @transform_1(%arg0: i32) -> (i32, i32) {
    %c0_i32 = arith.constant 0 : i32
    %c0_i32_0 = arith.constant 0 : i32
    %c0_i32_1 = arith.constant 0 : i32
    return %c0_i32, %c0_i32_0 : i32, i32
  }
  func.func @transform_2(%arg0: i32) -> (i32, i32) {
    %c0_i32 = arith.constant 0 : i32
    %c0_i32_0 = arith.constant 0 : i32
    %c0_i32_1 = arith.constant 0 : i32
    return %c0_i32, %c0_i32_0 : i32, i32
  }
  func.func @transform_3(%arg0: i32) -> (i32, i32) {
    %c0_i32 = arith.constant 0 : i32
    %c0_i32_0 = arith.constant 0 : i32
    %c0_i32_1 = arith.constant 0 : i32
    return %c0_i32, %c0_i32_0 : i32, i32
  }
  func.func @transform_4(%arg0: i32) -> (i32, i32) {
    %c0_i32 = arith.constant 0 : i32
    %c0_i32_0 = arith.constant 0 : i32
    %c0_i32_1 = arith.constant 0 : i32
    return %c0_i32, %c0_i32_0 : i32, i32
  }
  func.func @transform_5(%arg0: i32) -> (i32, i32) {
    %c0_i32 = arith.constant 0 : i32
    %c0_i32_0 = arith.constant 0 : i32
    return %arg0, %c0_i32 : i32, i32
  }
}

</mosaic_0001>

<bundles_post_ra>
// kernel: _classification_head.1
= control target key start
LH: loop header
LB: loop body
LE: loop exit
PB: predicated region body
PF: predicated region fallthrough
CT: control target
= control target key end

     0   :  { %v383_v1 = vmov 0.0   ;;  %vm384_vm0 = vmmov 0   ;;  %s485_s0 = inlined_call_operand.vmem [shape: bf16[8,128], index: 0, kind: input, shape index: {}]   ;;  %s486_s1 = inlined_call_operand.vmem [shape: bf16[128,128], index: 1, kind: input, shape index: {}]   ;;  %s487_s2 = inlined_call_operand.vmem [shape: f32[1,128], index: 2, kind: input, shape index: {}]   ;;  %s488_s3 = inlined_call_operand.vmem [shape: bf16[128,128], index: 3, kind: input, shape index: {}]   ;;  %s489_s4 = inlined_call_operand.vmem [shape: f32[1,128], index: 4, kind: input, shape index: {}]   ;;  %s490_s5 = inlined_call_operand.hbm [shape: f32[8,128], index: 5, kind: output, shape index: {}]  }
   0x1   :  { %v341_v0 = vld [vmem:[%s486_s1] sm:$0xff]   ;;  %298 = vmatprep.subr.bf16.mxu0 %v383_v1  ;;  %318 = vmatprep.subr.bf16.mxu1 %v383_v1  ;;  %v342_v2 = vld [vmem:[%s486_s1 + $0x8] sm:$0xff]   ;;  %v343_v3 = vld [vmem:[%s486_s1 + $0x10] sm:$0xff]  }
   0x2   :  { %299 = vmatpush3.bf16.msra.mxu0 %v341_v0  ;;  %314 = vmatprep.mubr.msk.bf16.mxu0 %vm384_vm0, %v383_v1  ;;  %v349_v4 = vld [vmem:[%s488_s3] sm:$0xff]   ;;  %v344_v5 = vld [vmem:[%s486_s1 + $0x18] sm:$0xff]   ;;  %v350_v6 = vld [vmem:[%s488_s3 + $0x8] sm:$0xff]  }
   0x3   :  { %300 = vmatprep.subr.bf16.mxu0 %v383_v1  ;;  %334 = vmatprep.mubr.msk.bf16.mxu1 %vm384_vm0, %v383_v1  ;;  %v345_v7 = vld [vmem:[%s486_s1 + $0x20] sm:$0xff]   ;;  %v351_v8 = vld [vmem:[%s488_s3 + $0x10] sm:$0xff]  }
   0x4   :  { %319 = vmatpush3.bf16.msra.mxu1 %v349_v4 }
   0x5   :  { %320 = vmatprep.subr.bf16.mxu1 %v383_v1 }
   0x6   :  { %301 = vmatpush3.bf16.msra.mxu0 %v342_v2 }
   0x7   :  { %302 = vmatprep.subr.bf16.mxu0 %v383_v1 }
   0x8   :  { %321 = vmatpush3.bf16.msra.mxu1 %v350_v6 }
   0xa   :  { %303 = vmatpush3.bf16.msra.mxu0 %v343_v3 }
   0xb   :  { %304 = vmatprep.subr.bf16.mxu0 %v383_v1 }
   0xe   :  { %305 = vmatpush3.bf16.msra.mxu0 %v344_v5 }
   0xf   :  { %306 = vmatprep.subr.bf16.mxu0 %v383_v1 }
  0x10   :  { %10 = vsyncpa [#allocation3], 0  ;;  %322 = vmatprep.subr.bf16.mxu1 %v383_v1  ;;  %v346_v9 = vld [vmem:[%s486_s1 + $0x28] sm:$0xff]   ;;  %v352_v10 = vld [vmem:[%s488_s3 + $0x18] sm:$0xff]   ;;  %s385_s29 = smov [#allocation2]  }
  0x11   :  { %323 = vmatpush3.bf16.msra.mxu1 %v351_v8  ;;  %v347_v11 = vld [vmem:[%s486_s1 + $0x30] sm:$0xff]   ;;  %v348_v12 = vld [vmem:[%s486_s1 + $0x38] sm:$0xff]   ;;  %v22_v13 = vld [vmem:[%s485_s0] sm:$0xf] }
  0x12   :  { %307 = vmatpush3.bf16.msra.mxu0 %v345_v7  ;;  %324 = vmatprep.subr.bf16.mxu1 %v383_v1  ;;  %v353_v14 = vld [vmem:[%s488_s3 + $0x20] sm:$0xff]   ;;  %v354_v15 = vld [vmem:[%s488_s3 + $0x28] sm:$0xff]   ;;  %v355_v16 = vld [vmem:[%s488_s3 + $0x30] sm:$0xff]  }
  0x13   :  { %308 = vmatprep.subr.bf16.mxu0 %v383_v1  ;;  %v356_v17 = vld [vmem:[%s488_s3 + $0x38] sm:$0xff]   ;;  %v262_v18 = vld [vmem:[%s487_s2] ss:$0 sm:$0xff]  ;;  %s254_s3 = sshll.u32 %s385_s29, 4  ;;  %s255_s3 = int_to_ptr.vmem [resolvable:$true] %s254_s3 }
  0x14   :  { %v271_v26 = vld [vmem:[%s489_s4] ss:$0 sm:$0xff]  ;;  %s359_s2 = scalar_lea.vmem %s255_s3, 128  ;;  %p364_p1 = scmp.lt.s32.totalorder %s255_s3, %s255_s3 }
  0x15   :  { %325 = vmatpush3.bf16.msra.mxu1 %v352_v10  ;;  %p360_p0 = scmp.ne.s32.totalorder %s255_s3, %s359_s2  ;;  %p365_p2 = scmp.lt.s32.totalorder %s359_s2, %s359_s2 }
  0x16   :  { %309 = vmatpush3.bf16.msra.mxu0 %v346_v9  ;;  %326 = vmatprep.subr.bf16.mxu1 %v383_v1 }
  0x17   :  { %310 = vmatprep.subr.bf16.mxu0 %v383_v1  ;;  %p366_p3 = por %p365_p2, %p364_p1 }
  0x19   :  { %327 = vmatpush3.bf16.msra.mxu1 %v353_v14  ;;  %p367_p4 = pnand %p366_p3, %p360_p0 }
  0x1a   :  { %311 = vmatpush3.bf16.msra.mxu0 %v347_v11  ;;  %328 = vmatprep.subr.bf16.mxu1 %v383_v1 }
  0x1b   :  { %312 = vmatprep.subr.bf16.mxu0 %v383_v1 }
  0x1d   :  { %329 = vmatpush3.bf16.msra.mxu1 %v354_v15 }
  0x1e   :  { %313 = vmatpush3.bf16.msra.mxu0 %v348_v12  ;;  %330 = vmatprep.subr.bf16.mxu1 %v383_v1 }
  0x21   :  { %315 = vmatmul.mubr.bf16.vlgmr.msra.gmra.mrb[0].mxu0 %v22_v13  ;;  %331 = vmatpush3.bf16.msra.mxu1 %v355_v16 }
  0x22   :  { %332 = vmatprep.subr.bf16.mxu1 %v383_v1 }
  0x25   :  { %333 = vmatpush3.bf16.msra.mxu1 %v356_v17 }
  0xf4   :  { %v128_v19 = vpop.f32.mrb[0].mxu0 }
  0xf5   :  { %v129_v20 = vadd.f32 %v262_v18, %v128_v19  ;;  %v316_v21 = vpop.f32.mrb[1].mxu0 }
  0xf6   :  { %v131_v22 = vpop.f32.mrb[2].mxu0 }
  0xf7   :  { %357 = vtanh.f32 %v129_v20  ;;  %v317_v23 = vpop.f32.mrb[3].mxu0 }
 0x101   :  { %v358_v24 = vpop.eup %357 }
 0x102   :  { %v135_v25 = vpack.c.bf16 %v358_v24, %v358_v24 }
 0x104   :  { %335 = vmatmul.mubr.bf16.vlgmr.msra.gmra.mrb[0].mxu1 %v135_v25 }
 0x1d7   :  { %v241_v27 = vpop.f32.mrb[0].mxu1 }
 0x1d8   :  { %v242_v28 = vadd.f32 %v271_v26, %v241_v27  ;;  %v336_v29 = vpop.f32.mrb[1].mxu1 }
 0x1d9   :  { %v244_v30 = vpop.f32.mrb[2].mxu1 }
 0x1da   :  { %247 = vst [vmem:[#allocation2] sm:$0xff] %v242_v28  ;;  %v337_v31 = vpop.f32.mrb[3].mxu1 }
 0x1db   :  { %370 = shalt.err (!%p367_p4)
}
 0x1dc   :  { %s371_s4 = scalar_lea.hbm %s490_s5, 128 }
 0x1dd   :  { %p372_p5 = scmp.ne.s32.totalorder %s490_s5, %s371_s4  ;;  %p375_p6 = scmp.lt.u32.totalorder %s371_s4, %s490_s5 }
 0x1df   :  { %p377_p7 = pnand %p375_p6, %p372_p5 }
 0x1e1   :  { %380 = shalt.err (!%p377_p7)
}
 0x1e2   :  { %257 = dma.vmem_to_hbm [thread:$0]  %s255_s3, 128, %s490_s5, [#allocation3]  }
 0x1e3   :  { %381 = dma.done.wait [#allocation3], 128  }
 0x1e4   :  { %382 = vsyncadd [#allocation3], 4294967168 }
 0x1e5   :  { %261 = vsyncpa [#allocation3], 1 }

// kernel: _classification_head.1
= control target key start
LH: loop header
LB: loop body
LE: loop exit
PB: predicated region body
PF: predicated region fallthrough
CT: control target
= control target key end

     0   :  { %v383_v1 = vmov 0.0   ;;  %vm384_vm0 = vmmov 0   ;;  %s485_s0 = inlined_call_operand.vmem [shape: bf16[8,128], index: 0, kind: input, shape index: {}]   ;;  %s486_s1 = inlined_call_operand.vmem [shape: bf16[128,128], index: 1, kind: input, shape index: {}]   ;;  %s487_s2 = inlined_call_operand.vmem [shape: f32[1,128], index: 2, kind: input, shape index: {}]   ;;  %s488_s3 = inlined_call_operand.vmem [shape: bf16[128,128], index: 3, kind: input, shape index: {}]   ;;  %s489_s4 = inlined_call_operand.vmem [shape: f32[1,128], index: 4, kind: input, shape index: {}]   ;;  %s490_s5 = inlined_call_operand.hbm [shape: f32[8,128], index: 5, kind: output, shape index: {}]  }
   0x1   :  { %v341_v0 = vld [vmem:[%s486_s1] sm:$0xff]   ;;  %298 = vmatprep.subr.bf16.mxu0 %v383_v1  ;;  %318 = vmatprep.subr.bf16.mxu1 %v383_v1  ;;  %v342_v2 = vld [vmem:[%s486_s1 + $0x8] sm:$0xff]   ;;  %v343_v3 = vld [vmem:[%s486_s1 + $0x10] sm:$0xff]  }
   0x2   :  { %299 = vmatpush3.bf16.msra.mxu0 %v341_v0  ;;  %314 = vmatprep.mubr.msk.bf16.mxu0 %vm384_vm0, %v383_v1  ;;  %v349_v4 = vld [vmem:[%s488_s3] sm:$0xff]   ;;  %v344_v5 = vld [vmem:[%s486_s1 + $0x18] sm:$0xff]   ;;  %v350_v6 = vld [vmem:[%s488_s3 + $0x8] sm:$0xff]  }
   0x3   :  { %300 = vmatprep.subr.bf16.mxu0 %v383_v1  ;;  %334 = vmatprep.mubr.msk.bf16.mxu1 %vm384_vm0, %v383_v1  ;;  %v345_v7 = vld [vmem:[%s486_s1 + $0x20] sm:$0xff]   ;;  %v351_v8 = vld [vmem:[%s488_s3 + $0x10] sm:$0xff]  }
   0x4   :  { %319 = vmatpush3.bf16.msra.mxu1 %v349_v4 }
   0x5   :  { %320 = vmatprep.subr.bf16.mxu1 %v383_v1 }
   0x6   :  { %301 = vmatpush3.bf16.msra.mxu0 %v342_v2 }
   0x7   :  { %302 = vmatprep.subr.bf16.mxu0 %v383_v1 }
   0x8   :  { %321 = vmatpush3.bf16.msra.mxu1 %v350_v6 }
   0xa   :  { %303 = vmatpush3.bf16.msra.mxu0 %v343_v3 }
   0xb   :  { %304 = vmatprep.subr.bf16.mxu0 %v383_v1 }
   0xe   :  { %305 = vmatpush3.bf16.msra.mxu0 %v344_v5 }
   0xf   :  { %306 = vmatprep.subr.bf16.mxu0 %v383_v1 }
  0x10   :  { %10 = vsyncpa [#allocation3], 0  ;;  %322 = vmatprep.subr.bf16.mxu1 %v383_v1  ;;  %v346_v9 = vld [vmem:[%s486_s1 + $0x28] sm:$0xff]   ;;  %v352_v10 = vld [vmem:[%s488_s3 + $0x18] sm:$0xff]   ;;  %s385_s29 = smov [#allocation2]  }
  0x11   :  { %323 = vmatpush3.bf16.msra.mxu1 %v351_v8  ;;  %v347_v11 = vld [vmem:[%s486_s1 + $0x30] sm:$0xff]   ;;  %v348_v12 = vld [vmem:[%s486_s1 + $0x38] sm:$0xff]   ;;  %v22_v13 = vld [vmem:[%s485_s0] sm:$0xf] }
  0x12   :  { %307 = vmatpush3.bf16.msra.mxu0 %v345_v7  ;;  %324 = vmatprep.subr.bf16.mxu1 %v383_v1  ;;  %v353_v14 = vld [vmem:[%s488_s3 + $0x20] sm:$0xff]   ;;  %v354_v15 = vld [vmem:[%s488_s3 + $0x28] sm:$0xff]   ;;  %v355_v16 = vld [vmem:[%s488_s3 + $0x30] sm:$0xff]  }
  0x13   :  { %308 = vmatprep.subr.bf16.mxu0 %v383_v1  ;;  %v356_v17 = vld [vmem:[%s488_s3 + $0x38] sm:$0xff]   ;;  %v262_v18 = vld [vmem:[%s487_s2] ss:$0 sm:$0xff]  ;;  %s254_s3 = sshll.u32 %s385_s29, 4  ;;  %s255_s3 = int_to_ptr.vmem [resolvable:$true] %s254_s3 }
  0x14   :  { %v271_v26 = vld [vmem:[%s489_s4] ss:$0 sm:$0xff]  ;;  %s359_s2 = scalar_lea.vmem %s255_s3, 128  ;;  %p364_p1 = scmp.lt.s32.totalorder %s255_s3, %s255_s3 }
  0x15   :  { %325 = vmatpush3.bf16.msra.mxu1 %v352_v10  ;;  %p360_p0 = scmp.ne.s32.totalorder %s255_s3, %s359_s2  ;;  %p365_p2 = scmp.lt.s32.totalorder %s359_s2, %s359_s2 }
  0x16   :  { %309 = vmatpush3.bf16.msra.mxu0 %v346_v9  ;;  %326 = vmatprep.subr.bf16.mxu1 %v383_v1 }
  0x17   :  { %310 = vmatprep.subr.bf16.mxu0 %v383_v1  ;;  %p366_p3 = por %p365_p2, %p364_p1 }
  0x19   :  { %327 = vmatpush3.bf16.msra.mxu1 %v353_v14  ;;  %p367_p4 = pnand %p366_p3, %p360_p0 }
  0x1a   :  { %311 = vmatpush3.bf16.msra.mxu0 %v347_v11  ;;  %328 = vmatprep.subr.bf16.mxu1 %v383_v1 }
  0x1b   :  { %312 = vmatprep.subr.bf16.mxu0 %v383_v1 }
  0x1d   :  { %329 = vmatpush3.bf16.msra.mxu1 %v354_v15 }
  0x1e   :  { %313 = vmatpush3.bf16.msra.mxu0 %v348_v12  ;;  %330 = vmatprep.subr.bf16.mxu1 %v383_v1 }
  0x21   :  { %315 = vmatmul.mubr.bf16.vlgmr.msra.gmra.mrb[0].mxu0 %v22_v13  ;;  %331 = vmatpush3.bf16.msra.mxu1 %v355_v16 }
  0x22   :  { %332 = vmatprep.subr.bf16.mxu1 %v383_v1 }
  0x25   :  { %333 = vmatpush3.bf16.msra.mxu1 %v356_v17 }
  0xf4   :  { %v128_v19 = vpop.f32.mrb[0].mxu0 }
  0xf5   :  { %v129_v20 = vadd.f32 %v262_v18, %v128_v19  ;;  %v316_v21 = vpop.f32.mrb[1].mxu0 }
  0xf6   :  { %v131_v22 = vpop.f32.mrb[2].mxu0 }
  0xf7   :  { %357 = vtanh.f32 %v129_v20  ;;  %v317_v23 = vpop.f32.mrb[3].mxu0 }
 0x101   :  { %v358_v24 = vpop.eup %357 }
 0x102   :  { %v135_v25 = vpack.c.bf16 %v358_v24, %v358_v24 }
 0x104   :  { %335 = vmatmul.mubr.bf16.vlgmr.msra.gmra.mrb[0].mxu1 %v135_v25 }
 0x1d7   :  { %v241_v27 = vpop.f32.mrb[0].mxu1 }
 0x1d8   :  { %v242_v28 = vadd.f32 %v271_v26, %v241_v27  ;;  %v336_v29 = vpop.f32.mrb[1].mxu1 }
 0x1d9   :  { %v244_v30 = vpop.f32.mrb[2].mxu1 }
 0x1da   :  { %247 = vst [vmem:[#allocation2] sm:$0xff] %v242_v28  ;;  %v337_v31 = vpop.f32.mrb[3].mxu1 }
 0x1db   :  { %370 = shalt.err (!%p367_p4)
}
 0x1dc   :  { %s371_s4 = scalar_lea.hbm %s490_s5, 128 }
 0x1dd   :  { %p372_p5 = scmp.ne.s32.totalorder %s490_s5, %s371_s4  ;;  %p375_p6 = scmp.lt.u32.totalorder %s371_s4, %s490_s5 }
 0x1df   :  { %p377_p7 = pnand %p375_p6, %p372_p5 }
 0x1e1   :  { %380 = shalt.err (!%p377_p7)
}
 0x1e2   :  { %257 = dma.vmem_to_hbm [thread:$0]  %s255_s3, 128, %s490_s5, [#allocation3]  }
 0x1e3   :  { %381 = dma.done.wait [#allocation3], 128  }
 0x1e4   :  { %382 = vsyncadd [#allocation3], 4294967168 }
 0x1e5   :  { %261 = vsyncpa [#allocation3], 1 }

</bundles_post_ra>
